<compile_context>
chip_gen: v7x
topology: tpu7x:2x2x1
jax: 0.10.0
libtpu: 0.0.40
codegen_flags: <defaults>
</compile_context>

<pallas_src>
import functools
import math

import numpy as np

import jax
import jax.numpy as jnp
from jax.experimental import pallas as pl
from jax.experimental.pallas import tpu as pltpu


def _conv_bn_lrelu_kernel(x_ref, w_ref, scale_ref, shift_ref, o_ref, *,
                          negative_slope, transpose_out):
    """One (image, row-tile) per grid step.

    x_ref:     (TH+2, W, 3*Cin) bf16  halo'd, kw-im2col'd input rows
    w_ref:     (3, 3*Cin, Cout) bf16  conv weights, leading index = kh
    scale_ref: (1, Cout) f32          fused per-(n, c) scale (dropout * bn)
    shift_ref: (1, Cout) f32          fused per-(n, c) shift (bias/bn folded)
    o_ref:     (TH*W, Cout)  or  (Cout, TH*W) if transpose_out
    """
    TH = x_ref.shape[0] - 2
    W = x_ref.shape[1]
    K = x_ref.shape[2]
    Cout = w_ref.shape[2]

    # 3 row-shifted matmuls with a fat K = 3*Cin contraction (kw taps were
    # folded into K in the wrapper).  The kh shift is a static slice along the
    # tile's major dim and the reshape is layout-preserving (W % 8 == 0), so
    # no shifted VMEM copies are materialized.
    acc = jnp.zeros((TH * W, Cout), jnp.float32)
    for kh in range(3):
        xs = x_ref[kh:kh + TH].reshape(TH * W, K)
        acc = acc + jnp.dot(xs, w_ref[kh],
                            preferred_element_type=jnp.float32)

    # Fused conv bias + Dropout2d channel scale + BatchNorm affine (f32),
    # then LeakyReLU(negative_slope).
    z = acc * scale_ref[...] + shift_ref[...]
    z = jnp.where(z >= 0, z, negative_slope * z)

    if transpose_out:
        # Cout < 128: one per-tile transpose so the store lane dim is TH*W.
        o_ref[...] = z.T.astype(o_ref.dtype)
    else:
        # Cout is a multiple of 128: already lane-dense, store NHWC-flat.
        o_ref[...] = z.astype(o_ref.dtype)


def _pick_row_tile(H, Wp, Cin, Cout, out_itemsize, k_itemsize,
                   budget_bytes=12 * 1024 * 1024):
    """Rows per tile so the per-step resident set (double-buffered x/out tiles
    + f32 accumulator) stays well inside the scoped-VMEM budget on every TPU
    generation (v5e 16 MiB default scoped, v7x 64 MiB physical)."""
    per_row = 2 * Wp * 3 * Cin * k_itemsize       # x tile, double-buffered
    per_row += 2 * Wp * Cout * out_itemsize       # out tile, double-buffered
    per_row += Wp * Cout * 4                      # f32 accumulator
    th = budget_bytes // max(per_row, 1)
    th = min(th, 512, max(H, 8))
    th = max(8, (th // 8) * 8)
    return int(th)


def conv_dropout_norm_nonlin(x, weight, bias, gamma, beta, running_mean,
                             running_var, *, eps=1e-5, negative_slope=0.01,
                             drop_scale=None, row_tile=None,
                             compute_dtype=jnp.bfloat16,
                             vmem_limit_bytes=32 * 1024 * 1024):
    """Fused Conv3x3(pad=1, bias) -> Dropout2d -> BatchNorm2d(stats) -> LeakyReLU.

    x:       (N, Cin, H, W)  NCHW, like PyTorch.
    weight:  (Cout, Cin, 3, 3); bias/gamma/beta/mean/var: (Cout,)
    drop_scale: optional (N, Cout) per-(sample, channel) Dropout2d scale
                (0.0 or 1/(1-p)); None => eval-mode (identity) dropout.
    Returns (N, Cout, H, W) in x.dtype.
    """
    N, Cin, H, W = x.shape
    Cout = weight.shape[0]
    assert weight.shape == (Cout, Cin, 3, 3), "only 3x3 / stride 1 / pad 1"

    out_dtype = x.dtype
    out_isz = np.dtype(out_dtype).itemsize
    k_isz = np.dtype(compute_dtype).itemsize

    # Pad W to a multiple of 8 (sublane) so in-kernel reshapes are free and
    # block shapes stay (8,128)-friendly; extra columns are zero and sliced
    # off at the end.
    Wp = ((W + 7) // 8) * 8

    # ---- row tile & grid -------------------------------------------------
    if row_tile is None:
        row_tile = _pick_row_tile(H, Wp, Cin, Cout, out_isz, k_isz)
    TH = max(8, (int(row_tile) // 8) * 8)
    T = -(-H // TH)                      # cdiv
    Hp = T * TH                          # row count after bottom padding

    # ---- one-time wrapper-side layout work (XLA ops) ---------------------
    # NCHW -> NHWC (bf16), zero-pad: 1 top + (1 + Hp-H) bottom, 1 left +
    # (1 + Wp-W) right.  Extra rows/cols are zeros -> conv output there is
    # garbage that gets sliced off.
    x_nhwc = jnp.transpose(x, (0, 2, 3, 1)).astype(compute_dtype)
    x_pad = jnp.pad(x_nhwc,
                    ((0, 0), (1, 1 + Hp - H), (1, 1 + Wp - W), (0, 0)))
    # kw-im2col: fold the 3 kw taps into the channel dim -> K = 3*Cin.
    # K index = kw*Cin + cin.
    x_kw = jnp.concatenate([x_pad[:, :, kw:kw + Wp, :] for kw in range(3)],
                           axis=-1)                       # (N, Hp+2, Wp, 3Cin)
    # Halo'd row tiles: tile t holds rows [t*TH, t*TH + TH + 2).
    rows = jnp.arange(T)[:, None] * TH + jnp.arange(TH + 2)[None, :]
    x_tiles = x_kw[:, rows]                               # (N, T, TH+2, Wp, 3Cin)

    # (Cout, Cin, 3, 3) -> (kh, kw*Cin + cin, Cout), matching x_kw's K order.
    w_k = jnp.transpose(weight, (2, 3, 1, 0)).reshape(3, 3 * Cin, Cout)
    w_k = w_k.astype(compute_dtype)

    # Fold conv bias, Dropout2d channel mask and BatchNorm affine into one
    # per-(n, c) scale/shift applied to the f32 accumulator:
    #   y = (conv(x) + b) * m[n,c]                       (bias, Dropout2d)
    #   z = (y - mean) * s + beta,  s = gamma*rsqrt(var+eps)   (BatchNorm2d)
    #     = conv(x) * (m*s) + (b*m*s + beta - mean*s)
    s = gamma.astype(jnp.float32) * jax.lax.rsqrt(
        running_var.astype(jnp.float32) + eps)
    m = (jnp.ones((N, Cout), jnp.float32) if drop_scale is None
         else drop_scale.astype(jnp.float32))
    scale = (m * s[None, :]).reshape(N, 1, Cout)
    shift = (bias.astype(jnp.float32)[None, :] * m * s[None, :]
             + beta.astype(jnp.float32)[None, :]
             - running_mean.astype(jnp.float32)[None, :] * s[None, :]
             ).reshape(N, 1, Cout)

    # Lane-dense output layout selection.
    transpose_out = (Cout % 128 != 0) and (T == 1 or (TH * Wp) % 128 == 0)

    kernel = functools.partial(_conv_bn_lrelu_kernel,
                               negative_slope=negative_slope,
                               transpose_out=transpose_out)

    if transpose_out:
        out_shape = jax.ShapeDtypeStruct((N, Cout, Hp * Wp), out_dtype)
        out_spec = pl.BlockSpec((None, Cout, TH * Wp), lambda n, t: (n, 0, t))
    else:
        out_shape = jax.ShapeDtypeStruct((N, Hp * Wp, Cout), out_dtype)
        out_spec = pl.BlockSpec((None, TH * Wp, Cout), lambda n, t: (n, t, 0))

    flops = 2 * N * H * W * 9 * Cin * Cout
    bytes_accessed = (x_tiles.size * k_isz + w_k.size * k_isz
                      + (scale.size + shift.size) * 4
                      + N * Hp * Wp * Cout * out_isz)

    out = pl.pallas_call(
        kernel,
        out_shape=out_shape,
        grid=(N, T),
        in_specs=[
            pl.BlockSpec((None, None, TH + 2, Wp, 3 * Cin),
                         lambda n, t: (n, t, 0, 0, 0)),
            # Grid-invariant weights / per-image scale & shift.
            pl.BlockSpec((3, 3 * Cin, Cout), lambda n, t: (0, 0, 0)),
            pl.BlockSpec((None, 1, Cout), lambda n, t: (n, 0, 0)),
            pl.BlockSpec((None, 1, Cout), lambda n, t: (n, 0, 0)),
        ],
        out_specs=out_spec,
        compiler_params=pltpu.CompilerParams(
            dimension_semantics=("parallel", "parallel"),
            vmem_limit_bytes=vmem_limit_bytes,
        ),
        cost_estimate=pl.CostEstimate(flops=flops, transcendentals=0,
                                      bytes_accessed=bytes_accessed),
    )(x_tiles, w_k, scale, shift)

    # Strip the row/column padding and return NCHW.
    if transpose_out:
        return out.reshape(N, Cout, Hp, Wp)[:, :, :H, :W]
    y = out.reshape(N, Hp, Wp, Cout)[:, :H, :W, :]
    return jnp.transpose(y, (0, 3, 1, 2))


class ConvDropoutNormNonlin:
    """JAX/Pallas analogue of the PyTorch ConvDropoutNormNonlin module
    (inference forward): Conv2d(3x3, stride 1, pad 1, bias) -> Dropout2d ->
    BatchNorm2d (with provided statistics) -> LeakyReLU(0.01)."""

    def __init__(self, weight, bias, gamma, beta, running_mean, running_var,
                 eps=1e-5, negative_slope=0.01):
        self.weight = weight
        self.bias = bias
        self.gamma = gamma
        self.beta = beta
        self.running_mean = running_mean
        self.running_var = running_var
        self.eps = eps
        self.negative_slope = negative_slope

    def __call__(self, x, drop_scale=None, row_tile=None):
        return conv_dropout_norm_nonlin(
            x, self.weight, self.bias, self.gamma, self.beta,
            self.running_mean, self.running_var, eps=self.eps,
            negative_slope=self.negative_slope, drop_scale=drop_scale,
            row_tile=row_tile)


if __name__ == "__main__":
    key = jax.random.PRNGKey(0)
    kx, kw_, kb, kg, kbe, km, kv, kd = jax.random.split(key, 8)

    N, Cin, Cout, H, W = 2, 4, 4, 16, 16
    x = jax.random.normal(kx, (N, Cin, H, W), jnp.float32)

    bound = 1.0 / math.sqrt(Cin * 9)
    weight = jax.random.uniform(kw_, (Cout, Cin, 3, 3), jnp.float32, -bound, bound)
    bias = jax.random.uniform(kb, (Cout,), jnp.float32, -bound, bound)
    gamma = jax.random.uniform(kg, (Cout,), jnp.float32, 0.5, 1.5)
    beta = 0.1 * jax.random.normal(kbe, (Cout,), jnp.float32)
    running_mean = 0.1 * jax.random.normal(km, (Cout,), jnp.float32)
    running_var = jax.random.uniform(kv, (Cout,), jnp.float32, 0.5, 1.5)

    def reference(x, weight, bias, gamma, beta, mean, var,
                  drop_scale=None, eps=1e-5, slope=0.01):
        # bf16-quantize the conv operands so the f32 reference matches the
        # bf16-operand / f32-accumulate MXU path tightly.
        xq = x.astype(jnp.bfloat16).astype(jnp.float32)
        wq = weight.astype(jnp.bfloat16).astype(jnp.float32)
        y = jax.lax.conv_general_dilated(
            xq, wq, window_strides=(1, 1), padding=((1, 1), (1, 1)),
            dimension_numbers=("NCHW", "OIHW", "NCHW"))
        y = y + bias[None, :, None, None]
        if drop_scale is not None:
            y = y * drop_scale[:, :, None, None]
        s = gamma / jnp.sqrt(var + eps)
        y = (y - mean[None, :, None, None]) * s[None, :, None, None] \
            + beta[None, :, None, None]
        return jnp.where(y >= 0, y, slope * y)

    module = ConvDropoutNormNonlin(weight, bias, gamma, beta,
                                   running_mean, running_var)

    # Eval-mode forward; row_tile=8 exercises the spatial row tiling (T=2,
    # halo'd tiles) and the lane-dense transposed store (Cout < 128).
    y = jax.block_until_ready(module(x, row_tile=8))
    ref = reference(x, weight, bias, gamma, beta, running_mean, running_var)
    assert y.shape == (N, Cout, H, W), y.shape
    assert jnp.allclose(y, ref, atol=2e-3, rtol=2e-3), \
        float(jnp.max(jnp.abs(y - ref)))

    # Dropout path with an explicit deterministic channel mask (p = 0.5).
    keep = jax.random.bernoulli(kd, 0.5, (N, Cout))
    drop_scale = keep.astype(jnp.float32) / 0.5
    y_drop = jax.block_until_ready(module(x, drop_scale=drop_scale, row_tile=8))
    ref_drop = reference(x, weight, bias, gamma, beta, running_mean,
                         running_var, drop_scale)
    assert jnp.allclose(y_drop, ref_drop, atol=2e-3, rtol=2e-3), \
        float(jnp.max(jnp.abs(y_drop - ref_drop)))

    # Cout = 128 exercises the non-transposed (NHWC-flat, lane-dense) output
    # path and the automatic row-tile selection.
    Cout2 = 128
    kw2, kb2 = jax.random.split(kg, 2)
    weight2 = jax.random.uniform(kw2, (Cout2, Cin, 3, 3), jnp.float32,
                                 -bound, bound)
    bias2 = jax.random.uniform(kb2, (Cout2,), jnp.float32, -bound, bound)
    ones = jnp.ones((Cout2,), jnp.float32)
    zeros = jnp.zeros((Cout2,), jnp.float32)
    module2 = ConvDropoutNormNonlin(weight2, bias2, ones, zeros, zeros, ones)
    y2 = jax.block_until_ready(module2(x))
    ref2 = reference(x, weight2, bias2, ones, zeros, zeros, ones)
    assert y2.shape == (N, Cout2, H, W), y2.shape
    assert jnp.allclose(y2, ref2, atol=2e-3, rtol=2e-3), \
        float(jnp.max(jnp.abs(y2 - ref2)))

    print("KERNEL_OK")
</pallas_src>

<mosaic_0001>
module attributes {stable_mosaic.version = 11 : i64} {
  func.func @_conv_bn_lrelu_kernel(%arg0: i32, %arg1: i32, %arg2: memref<1x1x10x16x12xbf16, #tpu.memory_space<vmem>>, %arg3: memref<3x12x4xbf16, #tpu.memory_space<vmem>>, %arg4: memref<1x1x4xf32, #tpu.memory_space<vmem>>, %arg5: memref<1x1x4xf32, #tpu.memory_space<vmem>>, %arg6: memref<1x4x128xf32, #tpu.memory_space<vmem>>) attributes {dimension_semantics = [#tpu.dimension_semantics<parallel>, #tpu.dimension_semantics<parallel>], iteration_bounds = array<i64: 2, 2>, scalar_prefetch = 0 : i64, scratch_operands = 0 : i64, tpu.core_type = #tpu.core_type<tc>, window_params = [{transform_indices = @transform_0, window_bounds = array<i64: 1, 1, 10, 16, 12>}, {pipeline_mode = #tpu.pipeline_mode<synchronous>, transform_indices = @transform_1, window_bounds = array<i64: 3, 12, 4>}, {transform_indices = @transform_2, window_bounds = array<i64: 1, 1, 4>}, {transform_indices = @transform_3, window_bounds = array<i64: 1, 1, 4>}, {transform_indices = @transform_4, window_bounds = array<i64: 1, 4, 128>}]} {
    %cst = arith.constant 0.000000e+00 : f32
    %0 = vector.broadcast %cst : f32 to vector<128x4xf32>
    %c0 = arith.constant 0 : index
    %c0_0 = arith.constant 0 : index
    %c0_1 = arith.constant 0 : index
    %c0_2 = arith.constant 0 : index
    %c0_3 = arith.constant 0 : index
    %1 = vector.load %arg2[%c0, %c0_0, %c0_1, %c0_2, %c0_3] : memref<1x1x10x16x12xbf16, #tpu.memory_space<vmem>>, vector<1x1x8x16x12xbf16>
    %2 = vector.shape_cast %1 : vector<1x1x8x16x12xbf16> to vector<8x16x12xbf16>
    %3 = vector.shape_cast %2 : vector<8x16x12xbf16> to vector<128x12xbf16>
    %c0_4 = arith.constant 0 : index
    %c0_5 = arith.constant 0 : index
    %c0_6 = arith.constant 0 : index
    %4 = vector.load %arg3[%c0_4, %c0_5, %c0_6] : memref<3x12x4xbf16, #tpu.memory_space<vmem>>, vector<1x12x4xbf16>
    %5 = vector.shape_cast %4 : vector<1x12x4xbf16> to vector<12x4xbf16>
    %cst_7 = arith.constant dense<0.000000e+00> : vector<128x4xf32>
    %6 = tpu.matmul %3, %5, %cst_7 {dimension_numbers = #tpu.dot_dimension_numbers<[1], [0], [0], [1], [0, 0, 1, 1], [], []>} : vector<128x12xbf16>, vector<12x4xbf16>, vector<128x4xf32> -> vector<128x4xf32>
    %7 = arith.addf %0, %6 : vector<128x4xf32>
    %c0_8 = arith.constant 0 : index
    %c0_9 = arith.constant 0 : index
    %c1 = arith.constant 1 : index
    %c0_10 = arith.constant 0 : index
    %c0_11 = arith.constant 0 : index
    %8 = vector.load %arg2[%c0_8, %c0_9, %c1, %c0_10, %c0_11] : memref<1x1x10x16x12xbf16, #tpu.memory_space<vmem>>, vector<1x1x8x16x12xbf16>
    %9 = vector.shape_cast %8 : vector<1x1x8x16x12xbf16> to vector<8x16x12xbf16>
    %10 = vector.shape_cast %9 : vector<8x16x12xbf16> to vector<128x12xbf16>
    %c1_12 = arith.constant 1 : index
    %c0_13 = arith.constant 0 : index
    %c0_14 = arith.constant 0 : index
    %11 = vector.load %arg3[%c1_12, %c0_13, %c0_14] : memref<3x12x4xbf16, #tpu.memory_space<vmem>>, vector<1x12x4xbf16>
    %12 = vector.shape_cast %11 : vector<1x12x4xbf16> to vector<12x4xbf16>
    %cst_15 = arith.constant dense<0.000000e+00> : vector<128x4xf32>
    %13 = tpu.matmul %10, %12, %cst_15 {dimension_numbers = #tpu.dot_dimension_numbers<[1], [0], [0], [1], [0, 0, 1, 1], [], []>} : vector<128x12xbf16>, vector<12x4xbf16>, vector<128x4xf32> -> vector<128x4xf32>
    %14 = arith.addf %7, %13 : vector<128x4xf32>
    %c0_16 = arith.constant 0 : index
    %c0_17 = arith.constant 0 : index
    %c2 = arith.constant 2 : index
    %c0_18 = arith.constant 0 : index
    %c0_19 = arith.constant 0 : index
    %15 = vector.load %arg2[%c0_16, %c0_17, %c2, %c0_18, %c0_19] : memref<1x1x10x16x12xbf16, #tpu.memory_space<vmem>>, vector<1x1x8x16x12xbf16>
    %16 = vector.shape_cast %15 : vector<1x1x8x16x12xbf16> to vector<8x16x12xbf16>
    %17 = vector.shape_cast %16 : vector<8x16x12xbf16> to vector<128x12xbf16>
    %c2_20 = arith.constant 2 : index
    %c0_21 = arith.constant 0 : index
    %c0_22 = arith.constant 0 : index
    %18 = vector.load %arg3[%c2_20, %c0_21, %c0_22] : memref<3x12x4xbf16, #tpu.memory_space<vmem>>, vector<1x12x4xbf16>
    %19 = vector.shape_cast %18 : vector<1x12x4xbf16> to vector<12x4xbf16>
    %cst_23 = arith.constant dense<0.000000e+00> : vector<128x4xf32>
    %20 = tpu.matmul %17, %19, %cst_23 {dimension_numbers = #tpu.dot_dimension_numbers<[1], [0], [0], [1], [0, 0, 1, 1], [], []>} : vector<128x12xbf16>, vector<12x4xbf16>, vector<128x4xf32> -> vector<128x4xf32>
    %21 = arith.addf %14, %20 : vector<128x4xf32>
    %c0_24 = arith.constant 0 : index
    %c0_25 = arith.constant 0 : index
    %c0_26 = arith.constant 0 : index
    %22 = vector.load %arg4[%c0_24, %c0_25, %c0_26] : memref<1x1x4xf32, #tpu.memory_space<vmem>>, vector<1x1x4xf32>
    %23 = vector.shape_cast %22 : vector<1x1x4xf32> to vector<1x4xf32>
    %24 = vector.broadcast %23 : vector<1x4xf32> to vector<128x4xf32>
    %25 = arith.mulf %21, %24 : vector<128x4xf32>
    %c0_27 = arith.constant 0 : index
    %c0_28 = arith.constant 0 : index
    %c0_29 = arith.constant 0 : index
    %26 = vector.load %arg5[%c0_27, %c0_28, %c0_29] : memref<1x1x4xf32, #tpu.memory_space<vmem>>, vector<1x1x4xf32>
    %27 = vector.shape_cast %26 : vector<1x1x4xf32> to vector<1x4xf32>
    %28 = vector.broadcast %27 : vector<1x4xf32> to vector<128x4xf32>
    %29 = arith.addf %25, %28 : vector<128x4xf32>
    %cst_30 = arith.constant 0.000000e+00 : f32
    %30 = vector.broadcast %cst_30 : f32 to vector<128x4xf32>
    %31 = arith.cmpf oge, %29, %30 : vector<128x4xf32>
    %cst_31 = arith.constant 0.00999999977 : f32
    %32 = vector.broadcast %cst_31 : f32 to vector<128x4xf32>
    %33 = arith.mulf %32, %29 : vector<128x4xf32>
    %34 = arith.select %31, %29, %33 : vector<128x4xi1>, vector<128x4xf32>
    %35 = tpu.transpose %34, [1, 0] : vector<128x4xf32> -> vector<4x128xf32>
    %c0_32 = arith.constant 0 : index
    %c0_33 = arith.constant 0 : index
    %c0_34 = arith.constant 0 : index
    %36 = vector.load %arg6[%c0_32, %c0_33, %c0_34] : memref<1x4x128xf32, #tpu.memory_space<vmem>>, vector<1x4x128xf32>
    %37 = vector.shape_cast %36 : vector<1x4x128xf32> to vector<4x128xf32>
    %38 = vector.shape_cast %35 : vector<4x128xf32> to vector<1x4x128xf32>
    tpu.vector_store %arg6[%c0_32, %c0_33, %c0_34], %38 {strides = array<i32>} : memref<1x4x128xf32, #tpu.memory_space<vmem>>, vector<1x4x128xf32>,
    return
  }
  func.func @transform_0(%arg0: i32, %arg1: i32) -> (i32, i32, i32, i32, i32) {
    %c0_i32 = arith.constant 0 : i32
    %c0_i32_0 = arith.constant 0 : i32
    %c0_i32_1 = arith.constant 0 : i32
    %c0_i32_2 = arith.constant 0 : i32
    return %arg0, %arg1, %c0_i32, %c0_i32_0, %c0_i32_1 : i32, i32, i32, i32, i32
  }
  func.func @transform_1(%arg0: i32, %arg1: i32) -> (i32, i32, i32) {
    %c0_i32 = arith.constant 0 : i32
    %c0_i32_0 = arith.constant 0 : i32
    %c0_i32_1 = arith.constant 0 : i32
    %c0_i32_2 = arith.constant 0 : i32
    return %c0_i32, %c0_i32_0, %c0_i32_1 : i32, i32, i32
  }
  func.func @transform_2(%arg0: i32, %arg1: i32) -> (i32, i32, i32) {
    %c0_i32 = arith.constant 0 : i32
    %c0_i32_0 = arith.constant 0 : i32
    %c0_i32_1 = arith.constant 0 : i32
    return %arg0, %c0_i32, %c0_i32_0 : i32, i32, i32
  }
  func.func @transform_3(%arg0: i32, %arg1: i32) -> (i32, i32, i32) {
    %c0_i32 = arith.constant 0 : i32
    %c0_i32_0 = arith.constant 0 : i32
    %c0_i32_1 = arith.constant 0 : i32
    return %arg0, %c0_i32, %c0_i32_0 : i32, i32, i32
  }
  func.func @transform_4(%arg0: i32, %arg1: i32) -> (i32, i32, i32) {
    %c0_i32 = arith.constant 0 : i32
    %c0_i32_0 = arith.constant 0 : i32
    return %arg0, %c0_i32, %arg1 : i32, i32, i32
  }
}

</mosaic_0001>

<bundles_post_ra>
// kernel: tpu_custom_call.1
= control target key start
LH: loop header
LB: loop body
LE: loop exit
PB: predicated region body
PF: predicated region fallthrough
CT: control target
= control target key end

     0   :  { %9 = vsyncpa [#allocation3], 0  ;;  %s1770_s0 = inlined_call_operand.vmem [shape: bf16[2,2,10,16,12], index: 0, kind: input, shape index: {}]   ;;  %s1771_s1 = inlined_call_operand.vmem [shape: bf16[3,12,4], index: 1, kind: input, shape index: {}]   ;;  %s1772_s2 = inlined_call_operand.vmem [shape: f32[2,1,4], index: 2, kind: input, shape index: {}]   ;;  %s1773_s3 = inlined_call_operand.vmem [shape: f32[2,1,4], index: 3, kind: input, shape index: {}]   ;;  %s1774_s4 = inlined_call_operand.hbm [shape: f32[2,4,256], index: 4, kind: output, shape index: {}]  }
   0x1   :  { %11 = vsyncpa [#allocation3 + $0x1], 0  ;;  %s1520_s15 = smov 0   ;;  %s1522_s16 = smov 0  }
   0x2   :  { %s1524_s17 = smov 0   ;;  %s1526_s18 = smov 0  }
   0x3   :  { %s1528_s19 = smov 0   ;;  %s1530_s20 = smov 0  }
   0x4   :  { %s1532_s21 = smov 0   ;;  %s1534_s22 = smov 0  }
   0x5 LB: > { %s1078_s23 = sadd.s32 4294967295, %s1492_s22   ;;  %s1079_s24 = sadd.s32 4294967294, %s1492_s22   ;;  %s1492_s22 = sphi %s1534_s22, %s17_s22   ;;  %s1488_s21 = sphi %s1532_s21, %s1783_s21   ;;  %s1484_s20 = sphi %s1530_s20, %s1782_s20   ;;  %s1480_s19 = sphi %s1528_s19, %s1781_s19   ;;  %s1476_s18 = sphi %s1526_s18, %s1780_s18   ;;  %s1472_s17 = sphi %s1524_s17, %s1779_s17   ;;  %s1468_s16 = sphi %s1522_s16, %s1778_s16   ;;  %s1464_s15 = sphi %s1520_s15, %s1777_s15  }
   0x6   : > { %s26_s25 = sadd.s32 1, %s1484_s20  ;;  %s29_s26 = sadd.s32 1, %s1488_s21 }
   0x7   : > { %p27_p0 = scmp.ge.s32.totalorder %s26_s25, 2  ;;  %p149_p1 = scmp.ne.s32.totalorder %s1472_s17, %s1468_s16 }
   0x8   : > { %p150_p2 = scmp.eq.s32.totalorder %s1078_s23, 3  ;;  %p155_p5 = scmp.ne.s32.totalorder %s1468_s16, %s1464_s15 }
   0x9   : > { %s1785_s25 = smov (%p27_p0, %s26_s25), 0  ;;  %s1787_s26 = smov (!%p27_p0, %s29_s26), %s1488_s21 }
   0xa   : > { %s135_s27 = ssub.s32 %s1484_s20, %s1785_s25  ;;  %p1571_p3 = por %p150_p2, %p149_p1 }
   0xb   : > { %p31_p4 = scmp.ge.s32.totalorder %s1787_s26, 2  ;;  %p156_p6 = scmp.eq.s32.totalorder %s1079_s24, 3 }
   0xc   : > { %p1082_p7 = scmp.ge.s32.totalorder %s1492_s22, 1  ;;  %p201_p9 = scmp.lt.s32.totalorder %s1492_s22, 5 }
   0xd   : > { %s1789_s26 = smov (%p31_p4, %s1787_s26), 0  ;;  %p1580_p8 = por %p156_p6, %p155_p5 }
   0xe   : > { %s134_s30 = ssub.s32 %s1488_s21, %s1789_s26  ;;  %s139_s5 = sadd.s32 1, %s1472_s17 }
   0xf   : > { %s136_s6 = sor.u32 %s135_s27, %s134_s30  ;;  %p202_p10 = pnand %p1082_p7, %p201_p9 }
  0x10   : > { %p137_p11 = scmp.eq.s32.totalorder %s136_s6, 0  ;;  %vm361_vm0 = vcmask (!%p202_p10), 1045504   ;;  %p237_p12 = scmp.lt.s32.totalorder (!%p202_p10), %s1480_s19, 1  ;;  %v1371_v0 = vld [vmem:[%s1771_s1] sm:$0x3f] (!%p202_p10)   ;;  %vm336_vm1 = vcmask (!%p202_p10), 97280  }
  0x11   : > { %205 = sbr.rel (%p202_p10) target bundleno = 415 (0x19f), region = 36  ;;  %v1372_v1 = vld [vmem:[%s1771_s1 + $0x8] sm:$0x3f] (!%p202_p10)   ;;  %1295 = vmatprep.subr.msk.bf16.mxu0 (!%p202_p10), %vm361_vm0, %v1371_v0  ;;  %v532_v2 = vsel (!%p202_p10), %vm361_vm0, %v1371_v0, 0  ;;  %p239_p13 = scmp.lt.s32.totalorder (!%p202_p10), %s1476_s18, 1 }
  0x12   : > { %s1589_s7 = scalar_select %p137_p11, %s1472_s17, %s139_s5  }
  0x13   : > { %v1375_v3 = vld [vmem:[%s1771_s1 + $0x10] sm:$0x3f] (!%p202_p10)   ;;  %1294 = vmatprep.subr.msk.bf16.mxu1 (!%p202_p10), %vm361_vm0, %v1372_v1  ;;  %1225 = vmatpush3.bf16.msra.mxu0 (!%p202_p10), %v532_v2  ;;  %v363_v4 = vsel (!%p202_p10), %vm361_vm0, %v1372_v1, 0 }
  0x14   : > { %1207 = vmatpush3.bf16.msra.mxu1 (!%p202_p10), %v363_v4  ;;  %1297 = vmatprep.subr.msk.bf16.mxu0 (!%p202_p10), %vm361_vm0, %v1375_v3  ;;  %v721_v9 = vsel (!%p202_p10), %vm361_vm0, %v1375_v3, 0 }
  0x15   : > { %1296 = vmatprep.subr.msk.bf16.mxu1 (!%p202_p10), %vm361_vm0, %v1371_v0 }
  0x18   : > { %s1599_s12 = scalar_select %p237_p12, %s1480_s19, 1 }
  0x19   : > { %s240_s24 = scalar_select %p239_p13, %s1476_s18, 1 }
  0x1a   : > { %s1299_s23 = smul.u32 40, %s1599_s12  ;;  %s248_s13 = scalar_lea.vmem %s1772_s2, %s1599_s12 }
  0x1b   : > { %s1298_s27 = smul.u32 20, %s240_s24  ;;  %s251_s24 = scalar_lea.vmem %s1773_s3, %s1599_s12  ;;  %v1675_v40 = vld [vmem:[%s248_s13] ss:$0 sm:$0xff] }
  0x1c   : > { %v1677_v44 = vld [vmem:[%s251_s24] ss:$0 sm:$0xff]  ;;  %s234_s12 = sand.u32 1, %s1468_s16  }
  0x1d   : > { %s243_s30 = sadd.s32 %s1299_s23, %s1298_s27  ;;  %s1083_s27 = sshll.u32 %s234_s12, 2 }
  0x1e   : > { %s1084_s5 = sshll.u32 %s243_s30, 2  ;;  %s1175_s30 = sshll.u32 %s1480_s19, 1 }
  0x1f   : > { %s1616_s9 = scalar_lea.vmem %s1770_s0, %s1084_s5  ;;  %s975_s5 = sadd.s32 %s1476_s18, %s1175_s30 }
  0x20   : > { %v1373_v5 = vld [vmem:[%s1616_s9 + $0x8] sm:$0xff]   ;;  %v1374_v6 = vld [vmem:[%s1616_s9] sm:$0xff]   ;;  %v1376_v7 = vld [vmem:[%s1616_s9 + $0x10] sm:$0xff]   ;;  %s236_s6 = scalar_lea.vmem [#allocation2], %s1083_s27  ;;  %s964_s14 = scalar_lea.sflag [#allocation3], %s234_s12 }
  0x21   : > { %1208 = vmatprep.mubr.msk.bf16.mxu1 %vm336_vm1, %v1373_v5  ;;  %1226 = vmatprep.mubr.msk.bf16.mxu0 %vm336_vm1, %v1374_v6  ;;  %v1377_v8 = vld [vmem:[%s1616_s9 + $0x8] sm:$0xff]   ;;  %v1378_v10 = vld [vmem:[%s1616_s9 + $0x18] sm:$0xff]   ;;  %v1379_v11 = vld [vmem:[%s1616_s9 + $0x10] sm:$0xff]   ;;  %s979_s8 = sshll.u32 %s236_s6, 4  ;;  %s1494_s18 = smov [#allocation2]   ;;  %s1714_s8 = int_to_ptr.vmem [resolvable:$true] %s979_s8 }
  0x22   : > { %1209 = vmatmul.mubr.msk.bf16.vlgmr.msra.gmra.mrb[0].mxu1 %vm336_vm1, %v1376_v7  ;;  %1227 = vmatmul.mubr.msk.bf16.vlgmr.msra.gmra.mrb[0].mxu0 %vm336_vm1, %v1377_v8  ;;  %v1380_v12 = vld [vmem:[%s1616_s9 + $0x20] sm:$0xff]   ;;  %v1381_v13 = vld [vmem:[%s1616_s9 + $0x18] sm:$0xff]   ;;  %v1382_v14 = vld [vmem:[%s1616_s9 + $0x28] sm:$0xff]   ;;  %s1398_s23 = scalar_lea.vmem %s1714_s8, 64  ;;  %s1402_s19 = sshll.u32 %s1494_s18, 4  ;;  %s1403_s19 = int_to_ptr.vmem [resolvable:$false] %s1402_s19 }
  0x23   : > { %1261 = vmatpush3.bf16.msra.mxu1 %v532_v2  ;;  %1243 = vmatpush3.bf16.msra.mxu0 %v721_v9  ;;  %v1383_v15 = vld [vmem:[%s1616_s9 + $0x10] sm:$0xff]   ;;  %v1385_v17 = vld [vmem:[%s1616_s9 + $0x18] sm:$0xff]   ;;  %v1387_v19 = vld [vmem:[%s1616_s9 + $0x20] sm:$0xff]   ;;  %p1399_p0 = scmp.ne.s32.totalorder %s1714_s8, %s1398_s23  ;;  %s1404_s24 = scalar_lea.vmem %s1403_s19, 128 }
  0x24   : > { %1212 = vmatprep.mubr.msk.bf16.mxu1 %vm336_vm1, %v1378_v10  ;;  %1230 = vmatprep.mubr.msk.bf16.mxu0 %vm336_vm1, %v1379_v11  ;;  %v1384_v16 = vld [vmem:[%s1616_s9 + $0x30] sm:$0xff]   ;;  %v1386_v18 = vld [vmem:[%s1616_s9 + $0x38] sm:$0xff]   ;;  %v1388_v20 = vld [vmem:[%s1616_s9 + $0x40] sm:$0xff]   ;;  %p1405_p4 = scmp.lt.s32.totalorder %s1714_s8, %s1403_s19  ;;  %p1406_p5 = scmp.lt.s32.totalorder %s1404_s24, %s1398_s23 }
  0x25   : > { %v1389_v21 = vld [vmem:[%s1616_s9 + $0x28] sm:$0xff]   ;;  %v1390_v22 = vld [vmem:[%s1616_s9 + $0x20] sm:$0xff]   ;;  %v1391_v23 = vld [vmem:[%s1616_s9 + $0x30] sm:$0xff]   ;;  %p1400_p1 = pnand %p1399_p0, %p1571_p3 }
  0x26   : > { %v1392_v24 = vld [vmem:[%s1616_s9 + $0x28] sm:$0xff]   ;;  %v1393_v25 = vld [vmem:[%s1616_s9 + $0x38] sm:$0xff]   ;;  %v1394_v26 = vld [vmem:[%s1616_s9 + $0x30] sm:$0xff]   ;;  %p1407_p6 = por %p1406_p5, %p1405_p4 }
  0x27   : > { %v1395_v27 = vld [vmem:[%s1616_s9 + $0x40] sm:$0xff]   ;;  %v1396_v28 = vld [vmem:[%s1616_s9 + $0x38] sm:$0xff]   ;;  %v1397_v29 = vld [vmem:[%s1616_s9 + $0x48] sm:$0xff]   ;;  %s1176_s9 = sshll.u32 %s975_s5, 6  ;;  %p1401_p2 = pneg %p1400_p1 }
  0x28   : > { %s1719_s13 = scalar_lea.hbm %s1774_s4, %s1176_s9 }
  0x29   : > { %p1408_p7 = pnand %p1407_p6, %p1401_p2 }
  0x2a   : > { %1213 = vmatmul.mubr.msk.bf16.gmra.mrb[4].mxu1 %vm336_vm1, %v1380_v12  ;;  %1231 = vmatmul.mubr.msk.bf16.gmra.mrb[4].mxu0 %vm336_vm1, %v1381_v13 }
  0x2b   : > { %1216 = vmatprep.mubr.msk.bf16.mxu1 %vm336_vm1, %v1382_v14  ;;  %1244 = vmatprep.mubr.msk.bf16.mxu0 %vm336_vm1, %v1383_v15 }
  0x32   : > { %1217 = vmatmul.mubr.msk.bf16.gmra.mrb[8].mxu1 %vm336_vm1, %v1384_v16  ;;  %1245 = vmatmul.mubr.msk.bf16.vlgmr.msra.gmra.mrb[0].mxu0 %vm336_vm1, %v1385_v17 }
  0x33   : > { %1220 = vmatprep.mubr.msk.bf16.mxu1 %vm336_vm1, %v1386_v18  ;;  %1248 = vmatprep.mubr.msk.bf16.mxu0 %vm336_vm1, %v1387_v19 }
  0x3a   : > { %1221 = vmatmul.mubr.msk.bf16.gmra.mrb[12].mxu1 %vm336_vm1, %v1388_v20  ;;  %1249 = vmatmul.mubr.msk.bf16.gmra.mrb[4].mxu0 %vm336_vm1, %v1389_v21 }
  0x3b   : > { %1234 = vmatprep.mubr.msk.bf16.mxu1 %vm336_vm1, %v1390_v22  ;;  %1252 = vmatprep.mubr.msk.bf16.mxu0 %vm336_vm1, %v1391_v23 }
  0x42   : > { %1235 = vmatmul.mubr.msk.bf16.vlgmr.msra.gmra.mrb[8].mxu1 %vm336_vm1, %v1392_v24  ;;  %1253 = vmatmul.mubr.msk.bf16.gmra.mrb[8].mxu0 %vm336_vm1, %v1393_v25 }
  0x43   : > { %1238 = vmatprep.mubr.msk.bf16.mxu1 %vm336_vm1, %v1394_v26  ;;  %1256 = vmatprep.mubr.msk.bf16.mxu0 %vm336_vm1, %v1395_v27 }
  0x4a   : > { %1239 = vmatmul.mubr.msk.bf16.gmra.mrb[12].mxu1 %vm336_vm1, %v1396_v28  ;;  %1257 = vmatmul.mubr.msk.bf16.gmra.mrb[12].mxu0 %vm336_vm1, %v1397_v29 }
  0xf5   : > { %v1210_v30 = vpop.f32.mrb[0].mxu1 }
  0xf6   : > { %v399_v31 = vpop.f32.mrb[1].mxu1 }
  0xf7   : > { %v1211_v32 = vpop.f32.mrb[2].mxu1 }
  0xf8   : > { %v402_v33 = vpop.f32.mrb[3].mxu1 }
  0xfd   : > { %v1214_v34 = vpop.f32.mrb[4].mxu1 }
  0xfe   : > { %v415_v35 = vpop.f32.mrb[5].mxu1 }
  0xff   : > { %v1215_v36 = vpop.f32.mrb[6].mxu1 }
 0x100   : > { %v418_v37 = vpop.f32.mrb[7].mxu1 }
 0x105   : > { %v1246_v38 = vpop.f32.mrb[0].mxu0 }
 0x106   : > { %v1262_v39 = vadd.f32 %v1246_v38, %v1210_v30  ;;  %v757_v41 = vpop.f32.mrb[1].mxu0 }
 0x107   : > { %v1263_v42 = vadd.f32 %v757_v41, %v399_v31  ;;  %v1247_v43 = vpop.f32.mrb[2].mxu0 }
 0x108   : > { %v1264_v45 = vadd.f32 %v1247_v43, %v1211_v32  ;;  %v760_v46 = vpop.f32.mrb[3].mxu0  ;;  %v845_v49 = vmul.f32 %v1262_v39, %v1675_v40 }
 0x109   : > { %v843_v47 = vmul.f32 %v1263_v42, %v1675_v40  ;;  %v1265_v48 = vadd.f32 %v760_v46, %v402_v33 }
 0x10a   : > { %v868_v55 = vadd.f32 %v1677_v44, %v845_v49  ;;  %v846_v58 = vmul.f32 %v1264_v45, %v1675_v40 }
 0x10b   : > { %v844_v50 = vmul.f32 %v1265_v48, %v1675_v40  ;;  %v866_v51 = vadd.f32 %v1677_v44, %v843_v47 }
 0x10c   : > { %v900_v2 = vmul.f32 0.01, %v868_v55  ;;  %v869_v3 = vadd.f32 %v1677_v44, %v846_v58  ;;  %vm884_vm4 = vcmp.ge.f32.partialorder %v868_v55, 0.0 }
 0x10d   : > { %v867_v52 = vadd.f32 %v1677_v44, %v844_v50  ;;  %v1250_v53 = vpop.f32.mrb[4].mxu0  ;;  %vm882_vm2 = vcmp.ge.f32.partialorder %v866_v51, 0.0  ;;  %v898_v54 = vmul.f32 0.01, %v866_v51 }
 0x10e   : > { %v1266_v56 = vadd.f32 %v1250_v53, %v1214_v34  ;;  %v773_v57 = vpop.f32.mrb[5].mxu0  ;;  %v916_v12 = vsel %vm884_vm4, %v868_v55, %v900_v2  ;;  %v901_v18 = vmul.f32 0.01, %v869_v3  ;;  %vm885_vm5 = vcmp.ge.f32.partialorder %v869_v3, 0.0 }
 0x10f   : > { %v1267_v59 = vadd.f32 %v773_v57, %v415_v35  ;;  %v1251_v60 = vpop.f32.mrb[6].mxu0  ;;  %v914_v61 = vsel %vm882_vm2, %v866_v51, %v898_v54  ;;  %v899_v62 = vmul.f32 0.01, %v867_v52  ;;  %vm883_vm3 = vcmp.ge.f32.partialorder %v867_v52, 0.0 }
 0x110   : > { %v1268_v63 = vadd.f32 %v1251_v60, %v1215_v36  ;;  %v776_v0 = vpop.f32.mrb[7].mxu0  ;;  %930 = vxpose.xlu0.b32.start [1/16] (narrow) %v914_v61, 8  ;;  %v849_v22 = vmul.f32 %v1266_v56, %v1675_v40  ;;  %v917_v24 = vsel %vm885_vm5, %v869_v3, %v901_v18 }
 0x111   : > { %v1269_v1 = vadd.f32 %v776_v0, %v418_v37  ;;  %v847_v4 = vmul.f32 %v1267_v59, %v1675_v40  ;;  %v915_v5 = vsel %vm883_vm3, %v867_v52, %v899_v62 }
 0x112   : > { %v872_v29 = vadd.f32 %v1677_v44, %v849_v22  ;;  %v850_v33 = vmul.f32 %v1268_v63, %v1675_v40 }
 0x113   : > { %v870_v13 = vadd.f32 %v1677_v44, %v847_v4  ;;  %v848_v14 = vmul.f32 %v1269_v1, %v1675_v40 }
 0x114   : > { %931 = vxpose.xlu0.b32.cont [2/16] (narrow) %v915_v5, 8  ;;  %v873_v43 = vadd.f32 %v1677_v44, %v850_v33  ;;  %v904_v47 = vmul.f32 0.01, %v872_v29  ;;  %vm888_vm8 = vcmp.ge.f32.partialorder %v872_v29, 0.0 }
 0x115   : > { %v1236_v6 = vpop.f32.mrb[8].mxu1  ;;  %v1254_v7 = vpop.f32.mrb[8].mxu0  ;;  %v871_v23 = vadd.f32 %v1677_v44, %v848_v14  ;;  %v902_v25 = vmul.f32 0.01, %v870_v13  ;;  %vm886_vm6 = vcmp.ge.f32.partialorder %v870_v13, 0.0 }
 0x116   : > { %v600_v8 = vpop.f32.mrb[9].mxu1  ;;  %v1270_v9 = vadd.f32 %v1254_v7, %v1236_v6  ;;  %v789_v10 = vpop.f32.mrb[9].mxu0  ;;  %v920_v50 = vsel %vm888_vm8, %v872_v29, %v904_v47  ;;  %v905_v51 = vmul.f32 0.01, %v873_v43  ;;  %vm889_vm9 = vcmp.ge.f32.partialorder %v873_v43, 0.0 }
 0x117   : > { %v1237_v11 = vpop.f32.mrb[10].mxu1  ;;  %v1271_v15 = vadd.f32 %v789_v10, %v600_v8  ;;  %v1255_v16 = vpop.f32.mrb[10].mxu0  ;;  %v918_v37 = vsel %vm886_vm6, %v870_v13, %v902_v25  ;;  %v903_v38 = vmul.f32 0.01, %v871_v23  ;;  %vm887_vm7 = vcmp.ge.f32.partialorder %v871_v23, 0.0 }
 0x118   : > { %v603_v17 = vpop.f32.mrb[11].mxu1  ;;  %v1272_v19 = vadd.f32 %v1255_v16, %v1237_v11  ;;  %v792_v20 = vpop.f32.mrb[11].mxu0  ;;  %932 = vxpose.xlu0.b32.cont [3/16] (narrow) %v916_v12, 8  ;;  %v853_v52 = vmul.f32 %v1270_v9, %v1675_v40  ;;  %v921_v54 = vsel %vm889_vm9, %v873_v43, %v905_v51 }
 0x119   : > { %v1273_v21 = vadd.f32 %v792_v20, %v603_v17  ;;  %v851_v45 = vmul.f32 %v1271_v15, %v1675_v40  ;;  %v919_v46 = vsel %vm887_vm7, %v871_v23, %v903_v38 }
 0x11a   : > { %v876_v56 = vadd.f32 %v1677_v44, %v853_v52  ;;  %v854_v57 = vmul.f32 %v1272_v19, %v1675_v40 }
 0x11b   : > { %v874_v48 = vadd.f32 %v1677_v44, %v851_v45  ;;  %v852_v49 = vmul.f32 %v1273_v21, %v1675_v40 }
 0x11c   : > { %933 = vxpose.xlu0.b32.cont [4/16] (narrow) %v917_v24, 8  ;;  %v877_v60 = vadd.f32 %v1677_v44, %v854_v57  ;;  %v908_v63 = vmul.f32 0.01, %v876_v56  ;;  %vm892_vm12 = vcmp.ge.f32.partialorder %v876_v56, 0.0 }
 0x11d   : > { %v1240_v26 = vpop.f32.mrb[12].mxu1  ;;  %v1258_v27 = vpop.f32.mrb[12].mxu0  ;;  %v875_v53 = vadd.f32 %v1677_v44, %v852_v49  ;;  %v906_v55 = vmul.f32 0.01, %v874_v48  ;;  %vm890_vm10 = vcmp.ge.f32.partialorder %v874_v48, 0.0 }
 0x11e   : > { %v616_v28 = vpop.f32.mrb[13].mxu1  ;;  %v1274_v30 = vadd.f32 %v1258_v27, %v1240_v26  ;;  %v805_v31 = vpop.f32.mrb[13].mxu0  ;;  %v924_v2 = vsel %vm892_vm12, %v876_v56, %v908_v63  ;;  %v909_v3 = vmul.f32 0.01, %v877_v60  ;;  %vm893_vm13 = vcmp.ge.f32.partialorder %v877_v60, 0.0 }
 0x11f   : > { %v1241_v32 = vpop.f32.mrb[14].mxu1  ;;  %v1275_v34 = vadd.f32 %v805_v31, %v616_v28  ;;  %v1259_v35 = vpop.f32.mrb[14].mxu0  ;;  %v922_v58 = vsel %vm890_vm10, %v874_v48, %v906_v55  ;;  %v907_v59 = vmul.f32 0.01, %v875_v53  ;;  %vm891_vm11 = vcmp.ge.f32.partialorder %v875_v53, 0.0 }
 0x120   : > { %v619_v36 = vpop.f32.mrb[15].mxu1  ;;  %v1276_v39 = vadd.f32 %v1259_v35, %v1241_v32  ;;  %v808_v41 = vpop.f32.mrb[15].mxu0  ;;  %934 = vxpose.xlu0.b32.cont [5/16] (narrow) %v918_v37, 8  ;;  %v857_v4 = vmul.f32 %v1274_v30, %v1675_v40  ;;  %v925_v6 = vsel %vm893_vm13, %v877_v60, %v909_v3 }
 0x121   : > { %v1277_v42 = vadd.f32 %v808_v41, %v619_v36  ;;  %v855_v61 = vmul.f32 %v1275_v34, %v1675_v40  ;;  %v923_v62 = vsel %vm891_vm11, %v875_v53, %v907_v59 }
 0x122   : > { %v880_v8 = vadd.f32 %v1677_v44, %v857_v4  ;;  %v858_v9 = vmul.f32 %v1276_v39, %v1675_v40 }
 0x123   : > { %v878_v0 = vadd.f32 %v1677_v44, %v855_v61  ;;  %v856_v1 = vmul.f32 %v1277_v42, %v1675_v40 }
 0x124   : > { %935 = vxpose.xlu0.b32.cont [6/16] (narrow) %v919_v46, 8  ;;  %v881_v12 = vadd.f32 %v1677_v44, %v858_v9  ;;  %v912_v14 = vmul.f32 0.01, %v880_v8  ;;  %vm896_vm0 = vcmp.ge.f32.partialorder %v880_v8, 0.0 }
 0x125   : > { %v879_v5 = vadd.f32 %v1677_v44, %v856_v1  ;;  %v910_v7 = vmul.f32 0.01, %v878_v0  ;;  %vm894_vm14 = vcmp.ge.f32.partialorder %v878_v0, 0.0 }
 0x126   : > { %v928_v15 = vsel %vm896_vm0, %v880_v8, %v912_v14  ;;  %v913_v16 = vmul.f32 0.01, %v881_v12  ;;  %vm897_vm1 = vcmp.ge.f32.partialorder %v881_v12, 0.0 }
 0x127   : > { %v926_v10 = vsel %vm894_vm14, %v878_v0, %v910_v7  ;;  %v911_v11 = vmul.f32 0.01, %v879_v5  ;;  %vm895_vm15 = vcmp.ge.f32.partialorder %v879_v5, 0.0 }
 0x128   : > { %936 = vxpose.xlu0.b32.cont [7/16] (narrow) %v920_v50, 8  ;;  %v929_v17 = vsel %vm897_vm1, %v881_v12, %v913_v16 }
 0x129   : > { %v927_v13 = vsel %vm895_vm15, %v879_v5, %v911_v11 }
 0x12c   : > { %937 = vxpose.xlu0.b32.cont [8/16] (narrow) %v921_v54, 8 }
 0x130   : > { %938 = vxpose.xlu0.b32.cont [9/16] (narrow) %v922_v58, 8 }
 0x134   : > { %939 = vxpose.xlu0.b32.cont [10/16] (narrow) %v923_v62, 8 }
 0x138   : > { %940 = vxpose.xlu0.b32.cont [11/16] (narrow) %v924_v2, 8 }
 0x13c   : > { %941 = vxpose.xlu0.b32.cont [12/16] (narrow) %v925_v6, 8 }
 0x140   : > { %942 = vxpose.xlu0.b32.cont [13/16] (narrow) %v926_v10, 8 }
 0x144   : > { %943 = vxpose.xlu0.b32.cont [14/16] (narrow) %v927_v13, 8 }
 0x148   : > { %944 = vxpose.xlu0.b32.cont [15/16] (narrow) %v928_v15, 8 }
 0x14c   : > { %945 = vxpose.xlu0.b32.end [16/16] (narrow) %v929_v17, 8 }
 0x190   : > { %v946_v40 = vpop.trf.xlu0 }
 0x191   : > { %962 = vst [vmem:[%s236_s6] sm:$0xf] %v946_v40 }
 0x192   : > { %1411 = shalt.err (!%p1408_p7)
}
 0x193   : > { %s1412_s12 = scalar_lea.hbm %s1719_s13, 64  ;;  %s1416_s5 = scalar_lea.hbm %s1774_s4, 256 }
 0x194   : > { %p1413_p9 = scmp.ne.s32.totalorder %s1719_s13, %s1412_s12  ;;  %p1417_p12 = scmp.lt.u32.totalorder %s1719_s13, %s1774_s4 }
 0x195   : > { %p1418_p13 = scmp.lt.u32.totalorder %s1416_s5, %s1412_s12  ;;  %p1420_p1 = scmp.lt.u32.totalorder %s1412_s12, %s1719_s13 }
 0x196   : > { %p1414_p10 = pnand %p1413_p9, %p1571_p3 }
 0x197   : > { %p1419_p0 = por %p1418_p13, %p1417_p12 }
 0x198   : > { %p1415_p11 = pneg %p1414_p10 }
 0x199   : > { %p1421_p2 = por %p1420_p1, %p1419_p0 }
 0x19b   : > { %p1422_p4 = pnand %p1421_p2, %p1415_p11 }
 0x19d   : > { %1425 = shalt.err (!%p1422_p4)
}
 0x19e   : > { %1300 = dma.vmem_to_hbm [thread:$0]  (%p1571_p3), %s1714_s8, 64, %s1719_s13, %s964_s14  }
 0x19f PF: > { %p1306_p5 = scmp.ge.s32.totalorder %s1492_s22, 2  ;;  %s991_s10 = sand.u32 1, %s1464_s15  }
 0x1a0   : > { %s992_s11 = scalar_lea.sflag [#allocation3], %s991_s10 }
 0x1a1   : > { %p1303_p6 = pnand %p1306_p5, %p1580_p8 }
 0x1a3   : > { %1459 = dma.done.wait (!%p1303_p6), %s992_s11, 64  }
 0x1a4   : > { %1461 = vsyncadd (!%p1303_p6), %s992_s11, 4294967232  ;;  %s17_s22 = sadd.s32 1, %s1492_s22   ;;  %s1777_s15 = smov %s1468_s16 }
 0x1a5   : > { %p14_p7 = scmp.ge.s32.totalorder %s17_s22, 6   ;;  %s1778_s16 = smov %s1472_s17 }
 0x1a6   : > { %s1779_s17 = smov %s1589_s7  ;;  %s1780_s18 = smov %s1484_s20 }
 0x1a7   : > { %s1781_s19 = smov %s1488_s21  ;;  %s1782_s20 = smov %s1785_s25 }
 0x1a8   : > { %s1783_s21 = smov %s1789_s26  ;;  %16 = sbr.rel (!%p14_p7) target bundleno = 5 (0x5), region = 81 }
 0x1af   :  { %997 = vsyncpa [#allocation3], 1 }
 0x1b0   :  { %999 = vsyncpa [#allocation3 + $0x1], 1 }

</bundles_post_ra>
